<compile_context>
chip_gen: v6e
topology: v6e:2x2x1
jax: 0.10.0
libtpu: 0.0.40
codegen_flags: <defaults>
</compile_context>

<pallas_src>
import functools

import jax
import jax.numpy as jnp
from jax.experimental import pallas as pl
from jax.experimental.pallas import tpu as pltpu


def _round_up(n, m):
    return ((n + m - 1) // m) * m


def _cdiv(a, b):
    return (a + b - 1) // b


def _lane_pad(n):
    # Lane-dense padding. Dims >128 go to multiples of 256 (v6e/v7x 2x256x256
    # MXU tile); dims <=128 stay at the 128 lane width (native on v5e too).
    return 128 if n <= 128 else _round_up(n, 256)


def _vmem_caps():
    """(budget_for_tiling, vmem_limit_bytes), generation-aware."""
    cap = 64 * 1024 * 1024            # conservative default == v7x physical VMEM
    try:
        cap = int(pltpu.get_tpu_info().vmem_capacity_bytes)
    except Exception:
        pass
    budget = max(16 << 20, int(cap * 0.60))          # ~38 MiB v7x, ~77 MiB v5e/v6e
    limit = min(cap - (4 << 20), int(cap * 0.80))
    return budget, int(limit)


# --------------------------------------------------------------------------
# Kernel
# --------------------------------------------------------------------------
def vae_forward_kernel(x_ref, eps_ref,
                       w1_ref, b1_ref,
                       w2122_ref, b2122_ref,
                       w3_ref, b3_ref,
                       w4_ref, b4_ref,
                       recon_ref, ml_ref,
                       *, pad_lat):
    x = x_ref[...]                                # (TB, pad_in)  bf16
    eps = eps_ref[...].astype(jnp.float32)        # (TB, pad_lat) upcast in-register

    # encode: h1 = relu(fc1(x))  -- bf16 MXU operands, f32 accumulation.
    h1 = jnp.dot(x, w1_ref[...], preferred_element_type=jnp.float32) + b1_ref[...]
    h1 = jnp.maximum(h1, 0.0)

    # fused fc21|fc22 head: one MXU dot; stored directly (no concat, f32).
    ml = jnp.dot(h1.astype(jnp.bfloat16), w2122_ref[...],
                 preferred_element_type=jnp.float32) + b2122_ref[...]
    ml_ref[...] = ml                               # [mu | logvar], 128-aligned halves

    mu = ml[:, :pad_lat]
    logvar = ml[:, pad_lat:]

    # reparameterize in f32: z = mu + eps * exp(0.5 * logvar)
    z = mu + eps * jnp.exp(0.5 * logvar)

    # decode: recon = tanh(fc4(relu(fc3(z))))
    h3 = jnp.dot(z.astype(jnp.bfloat16), w3_ref[...],
                 preferred_element_type=jnp.float32) + b3_ref[...]
    h3 = jnp.maximum(h3, 0.0)
    recon = jnp.tanh(jnp.dot(h3.astype(jnp.bfloat16), w4_ref[...],
                             preferred_element_type=jnp.float32) + b4_ref[...])
    recon_ref[...] = recon.astype(recon_ref.dtype)   # bf16 output stream


# --------------------------------------------------------------------------
# Parameter packing (done once, outside the per-call forward path)
# --------------------------------------------------------------------------
def pack_vae_params(params, input_space, latent_space):
    hidden = 2 * latent_space
    pad_in = _lane_pad(input_space)
    pad_lat = _lane_pad(latent_space)
    pad_hid = _lane_pad(hidden)

    def pad2(a, rows, cols):
        return jnp.pad(a, ((0, rows - a.shape[0]), (0, cols - a.shape[1])))

    packed = dict(
        w1=pad2(params["w1"], pad_in, pad_hid).astype(jnp.bfloat16),
        b1=pad2(params["b1"], 1, pad_hid),                          # f32
        w2122=jnp.concatenate(
            [pad2(params["w21"], pad_hid, pad_lat),
             pad2(params["w22"], pad_hid, pad_lat)], axis=1).astype(jnp.bfloat16),
        b2122=jnp.concatenate(
            [pad2(params["b21"], 1, pad_lat),
             pad2(params["b22"], 1, pad_lat)], axis=1),             # f32
        w3=pad2(params["w3"], pad_lat, pad_hid).astype(jnp.bfloat16),
        b3=pad2(params["b3"], 1, pad_hid),
        w4=pad2(params["w4"], pad_hid, pad_in).astype(jnp.bfloat16),
        b4=pad2(params["b4"], 1, pad_in),
    )
    meta = dict(input_space=input_space, latent_space=latent_space,
                pad_in=pad_in, pad_lat=pad_lat, pad_hid=pad_hid)
    return packed, meta


def _pick_tb(B, pad_in, pad_lat, pad_hid, resident_bytes, vmem_budget, block_b):
    """Largest batch tile (multiple of 16) that fits the honest VMEM budget,
    keeps >=~4 grid steps (v7x megacore), and avoids batch-tail blowup."""
    # double-buffered streamed tiles: bf16 x, bf16 eps, bf16 recon, f32 mu|logvar
    stream_row = 2 * (2 * pad_in + 2 * pad_lat + 2 * pad_in + 4 * 2 * pad_lat)
    # f32 intermediates held live in the body (h1, ml/z, h3/recon)
    interm_row = 4 * (2 * pad_hid + 2 * pad_lat + pad_in)
    avail = vmem_budget - resident_bytes
    if avail <= 0:
        # TODO(synk): packed weights alone exceed the VMEM budget (possible on
        # v7x at very large dims) -> would need a K-tiled grid or manual weight DMA.
        avail = vmem_budget // 4
    tb_max = max(16, (min(block_b, avail // (stream_row + interm_row)) // 16) * 16)
    tb_max = min(tb_max, max(16, _round_up(B, 16)))
    # keep >= ~4 grid steps when the batch allows it (2 TCs on v7x)
    tb_max = min(tb_max, max(16, _round_up(_cdiv(B, 4), 16)))
    # minimize padded rows + per-step pipeline overhead (~0.35us ~= 32 row-equivalents)
    best_tb, best_cost = 16, None
    for tb in range(16, tb_max + 1, 16):
        bp = _round_up(B, tb)
        cost = bp + 32 * _cdiv(bp, tb)
        if best_cost is None or cost <= best_cost:
            best_tb, best_cost = tb, cost
    return best_tb


# --------------------------------------------------------------------------
# Forward wrapper
# --------------------------------------------------------------------------
def vec_vae_forward(x, eps, packed, meta, *, block_b=1024):
    """VecVAE.forward via one Pallas kernel.

    x: [B, input_space] f32, eps: [B, latent_space] f32 (the randn_like sample),
    packed/meta from pack_vae_params. Returns (recon, mu, logvar) f32, unpadded.
    """
    B, input_space = x.shape
    latent_space = eps.shape[1]
    assert input_space == meta["input_space"] and latent_space == meta["latent_space"]
    pad_in, pad_lat, pad_hid = meta["pad_in"], meta["pad_lat"], meta["pad_hid"]
    hidden = 2 * latent_space

    vmem_budget, vmem_limit = _vmem_caps()
    resident_bytes = sum(int(a.size) * a.dtype.itemsize for a in packed.values())

    TB = _pick_tb(B, pad_in, pad_lat, pad_hid, resident_bytes, vmem_budget, block_b)
    Bp = _round_up(B, TB)

    # stream activations as bf16 (kernel is HBM-BW bound; MXU operands are bf16)
    x_p = jnp.pad(x, ((0, Bp - B), (0, pad_in - input_space))).astype(jnp.bfloat16)
    eps_p = jnp.pad(eps, ((0, Bp - B), (0, pad_lat - latent_space))).astype(jnp.bfloat16)

    grid = (Bp // TB,)
    batched = lambda i: (i, 0)       # x / eps / outputs march over the batch axis
    resident = lambda i: (0, 0)      # weights & biases stay VMEM-resident

    flops = 2 * B * (input_space * hidden + hidden * (2 * latent_space)
                     + latent_space * hidden + hidden * input_space)
    transcendentals = B * (latent_space + input_space)          # exp + tanh
    bytes_accessed = int((x_p.size + eps_p.size) * 2 + resident_bytes
                         + Bp * pad_in * 2 + Bp * 2 * pad_lat * 4)

    def run(single_buffer_residents):
        if single_buffer_residents:
            res = lambda s: pl.BlockSpec(s, resident, pipeline_mode=pl.Buffered(1))
        else:
            res = lambda s: pl.BlockSpec(s, resident)
        in_specs = [
            pl.BlockSpec((TB, pad_in), batched),
            pl.BlockSpec((TB, pad_lat), batched),
            res(packed["w1"].shape), res(packed["b1"].shape),
            res(packed["w2122"].shape), res(packed["b2122"].shape),
            res(packed["w3"].shape), res(packed["b3"].shape),
            res(packed["w4"].shape), res(packed["b4"].shape),
        ]
        out_specs = (
            pl.BlockSpec((TB, pad_in), batched),          # recon (bf16)
            pl.BlockSpec((TB, 2 * pad_lat), batched),     # mu | logvar (f32)
        )
        return pl.pallas_call(
            functools.partial(vae_forward_kernel, pad_lat=pad_lat),
            grid=grid,
            in_specs=in_specs,
            out_specs=out_specs,
            out_shape=(jax.ShapeDtypeStruct((Bp, pad_in), jnp.bfloat16),
                       jax.ShapeDtypeStruct((Bp, 2 * pad_lat), jnp.float32)),
            compiler_params=pltpu.CompilerParams(
                dimension_semantics=("parallel",),
                vmem_limit_bytes=vmem_limit,
            ),
            cost_estimate=pl.CostEstimate(
                flops=flops, transcendentals=transcendentals,
                bytes_accessed=bytes_accessed),
        )(x_p, eps_p, packed["w1"], packed["b1"], packed["w2122"], packed["b2122"],
          packed["w3"], packed["b3"], packed["w4"], packed["b4"])

    try:
        recon_p, ml_p = run(True)
    except Exception:
        # pl.Buffered(1) on resident specs not supported by this jax version:
        # fall back to default double-buffered residents (correctness identical).
        recon_p, ml_p = run(False)

    recon = recon_p[:B, :input_space].astype(jnp.float32)
    mu = ml_p[:B, :latent_space]
    logvar = ml_p[:B, pad_lat:pad_lat + latent_space]
    return recon, mu, logvar


# --------------------------------------------------------------------------
# Init / reference / demo
# --------------------------------------------------------------------------
def init_params(key, input_space, latent_space):
    """PyTorch layer l has weight [out, in], bias [out]; we store weight
    transposed ([in, out]) and bias as [1, out]."""
    hidden = latent_space * 2
    shapes = {
        "w1": (input_space, hidden),   "b1": (1, hidden),
        "w21": (hidden, latent_space), "b21": (1, latent_space),
        "w22": (hidden, latent_space), "b22": (1, latent_space),
        "w3": (latent_space, hidden),  "b3": (1, hidden),
        "w4": (hidden, input_space),   "b4": (1, input_space),
    }
    params = {}
    for name, shp in sorted(shapes.items()):
        key, sub = jax.random.split(key)
        fan_in = shp[0] if name.startswith("w") else shp[1]
        bound = 1.0 / jnp.sqrt(jnp.float32(fan_in))
        params[name] = jax.random.uniform(
            sub, shp, dtype=jnp.float32, minval=-bound, maxval=bound)
    return params


def reference_forward(x, eps, params):
    h1 = jnp.maximum(x @ params["w1"] + params["b1"], 0.0)
    mu = h1 @ params["w21"] + params["b21"]
    logvar = h1 @ params["w22"] + params["b22"]
    z = mu + eps * jnp.exp(0.5 * logvar)
    h3 = jnp.maximum(z @ params["w3"] + params["b3"], 0.0)
    recon = jnp.tanh(h3 @ params["w4"] + params["b4"])
    return recon, mu, logvar


if __name__ == "__main__":
    input_space = 16
    latent_space = 8
    batch = 8

    key = jax.random.PRNGKey(0)
    k_param, k_x, k_eps = jax.random.split(key, 3)

    params = init_params(k_param, input_space, latent_space)
    x = jax.random.normal(k_x, (batch, input_space), dtype=jnp.float32)
    eps = jax.random.normal(k_eps, (batch, latent_space), dtype=jnp.float32)

    # pack / pad / fuse the weights ONCE (outside the per-call forward path)
    packed, meta = pack_vae_params(params, input_space, latent_space)

    recon, mu, logvar = vec_vae_forward(x, eps, packed, meta)
    jax.block_until_ready((recon, mu, logvar))

    assert recon.shape == (batch, input_space)
    assert mu.shape == (batch, latent_space)
    assert logvar.shape == (batch, latent_space)

    r_ref, m_ref, lv_ref = reference_forward(x, eps, params)
    # bf16 activations/weights on the MXU (f32 accumulation) + bf16 recon stream
    # -> tolerances reflect bf16 input/output rounding.
    assert jnp.allclose(mu, m_ref, atol=4e-2, rtol=4e-2)
    assert jnp.allclose(logvar, lv_ref, atol=4e-2, rtol=4e-2)
    assert jnp.allclose(recon, r_ref, atol=5e-2, rtol=5e-2)

    print("KERNEL_OK")
</pallas_src>

<mosaic_0001>
module attributes {stable_mosaic.version = 11 : i64} {
  func.func @vae_forward_kernel(%arg0: i32, %arg1: memref<16x128xbf16, #tpu.memory_space<vmem>>, %arg2: memref<16x128xbf16, #tpu.memory_space<vmem>>, %arg3: memref<128x128xbf16, #tpu.memory_space<vmem>>, %arg4: memref<1x128xf32, #tpu.memory_space<vmem>>, %arg5: memref<128x256xbf16, #tpu.memory_space<vmem>>, %arg6: memref<1x256xf32, #tpu.memory_space<vmem>>, %arg7: memref<128x128xbf16, #tpu.memory_space<vmem>>, %arg8: memref<1x128xf32, #tpu.memory_space<vmem>>, %arg9: memref<128x128xbf16, #tpu.memory_space<vmem>>, %arg10: memref<1x128xf32, #tpu.memory_space<vmem>>, %arg11: memref<16x128xbf16, #tpu.memory_space<vmem>>, %arg12: memref<16x256xf32, #tpu.memory_space<vmem>>) attributes {dimension_semantics = [#tpu.dimension_semantics<parallel>], iteration_bounds = array<i64: 1>, scalar_prefetch = 0 : i64, scratch_operands = 0 : i64, tpu.core_type = #tpu.core_type<tc>, window_params = [{transform_indices = @transform_0, window_bounds = array<i64: 16, 128>}, {transform_indices = @transform_1, window_bounds = array<i64: 16, 128>}, {pipeline_mode = #tpu.pipeline_mode<synchronous>, transform_indices = @transform_2, window_bounds = array<i64: 128, 128>}, {pipeline_mode = #tpu.pipeline_mode<synchronous>, transform_indices = @transform_3, window_bounds = array<i64: 1, 128>}, {pipeline_mode = #tpu.pipeline_mode<synchronous>, transform_indices = @transform_4, window_bounds = array<i64: 128, 256>}, {pipeline_mode = #tpu.pipeline_mode<synchronous>, transform_indices = @transform_5, window_bounds = array<i64: 1, 256>}, {pipeline_mode = #tpu.pipeline_mode<synchronous>, transform_indices = @transform_6, window_bounds = array<i64: 128, 128>}, {pipeline_mode = #tpu.pipeline_mode<synchronous>, transform_indices = @transform_7, window_bounds = array<i64: 1, 128>}, {pipeline_mode = #tpu.pipeline_mode<synchronous>, transform_indices = @transform_8, window_bounds = array<i64: 128, 128>}, {pipeline_mode = #tpu.pipeline_mode<synchronous>, transform_indices = @transform_9, window_bounds = array<i64: 1, 128>}, {transform_indices = @transform_10, window_bounds = array<i64: 16, 128>}, {transform_indices = @transform_11, window_bounds = array<i64: 16, 256>}]} {
    %c0 = arith.constant 0 : index
    %c0_0 = arith.constant 0 : index
    %0 = vector.load %arg1[%c0, %c0_0] : memref<16x128xbf16, #tpu.memory_space<vmem>>, vector<16x128xbf16>
    %c0_1 = arith.constant 0 : index
    %c0_2 = arith.constant 0 : index
    %1 = vector.load %arg2[%c0_1, %c0_2] : memref<16x128xbf16, #tpu.memory_space<vmem>>, vector<16x128xbf16>
    %2 = arith.extf %1 : vector<16x128xbf16> to vector<16x128xf32>
    %c0_3 = arith.constant 0 : index
    %c0_4 = arith.constant 0 : index
    %3 = vector.load %arg3[%c0_3, %c0_4] : memref<128x128xbf16, #tpu.memory_space<vmem>>, vector<128x128xbf16>
    %cst = arith.constant dense<0.000000e+00> : vector<16x128xf32>
    %4 = tpu.matmul %0, %3, %cst {dimension_numbers = #tpu.dot_dimension_numbers<[1], [0], [0], [1], [0, 0, 1, 1], [], []>} : vector<16x128xbf16>, vector<128x128xbf16>, vector<16x128xf32> -> vector<16x128xf32>
    %c0_5 = arith.constant 0 : index
    %c0_6 = arith.constant 0 : index
    %5 = vector.load %arg4[%c0_5, %c0_6] : memref<1x128xf32, #tpu.memory_space<vmem>>, vector<1x128xf32>
    %6 = vector.broadcast %5 : vector<1x128xf32> to vector<16x128xf32>
    %7 = arith.addf %4, %6 : vector<16x128xf32>
    %cst_7 = arith.constant 0.000000e+00 : f32
    %8 = vector.broadcast %cst_7 : f32 to vector<16x128xf32>
    %9 = arith.maximumf %7, %8 : vector<16x128xf32>
    %10 = arith.truncf %9 : vector<16x128xf32> to vector<16x128xbf16>
    %c0_8 = arith.constant 0 : index
    %c0_9 = arith.constant 0 : index
    %11 = vector.load %arg5[%c0_8, %c0_9] : memref<128x256xbf16, #tpu.memory_space<vmem>>, vector<128x256xbf16>
    %cst_10 = arith.constant dense<0.000000e+00> : vector<16x256xf32>
    %12 = tpu.matmul %10, %11, %cst_10 {dimension_numbers = #tpu.dot_dimension_numbers<[1], [0], [0], [1], [0, 0, 1, 1], [], []>} : vector<16x128xbf16>, vector<128x256xbf16>, vector<16x256xf32> -> vector<16x256xf32>
    %c0_11 = arith.constant 0 : index
    %c0_12 = arith.constant 0 : index
    %13 = vector.load %arg6[%c0_11, %c0_12] : memref<1x256xf32, #tpu.memory_space<vmem>>, vector<1x256xf32>
    %14 = vector.broadcast %13 : vector<1x256xf32> to vector<16x256xf32>
    %15 = arith.addf %12, %14 : vector<16x256xf32>
    %c0_13 = arith.constant 0 : index
    %c0_14 = arith.constant 0 : index
    %16 = vector.load %arg12[%c0_13, %c0_14] : memref<16x256xf32, #tpu.memory_space<vmem>>, vector<16x256xf32>
    tpu.vector_store %arg12[%c0_13, %c0_14], %15 {strides = array<i32>} : memref<16x256xf32, #tpu.memory_space<vmem>>, vector<16x256xf32>,
    %17 = vector.extract_strided_slice %15 {offsets = [0, 0], sizes = [16, 128], strides = [1, 1]} : vector<16x256xf32> to vector<16x128xf32>
    %18 = vector.extract_strided_slice %15 {offsets = [0, 128], sizes = [16, 128], strides = [1, 1]} : vector<16x256xf32> to vector<16x128xf32>
    %cst_15 = arith.constant 5.000000e-01 : f32
    %19 = vector.broadcast %cst_15 : f32 to vector<16x128xf32>
    %20 = arith.mulf %19, %18 : vector<16x128xf32>
    %21 = math.exp %20 : vector<16x128xf32>
    %22 = arith.mulf %2, %21 : vector<16x128xf32>
    %23 = arith.addf %17, %22 : vector<16x128xf32>
    %24 = arith.truncf %23 : vector<16x128xf32> to vector<16x128xbf16>
    %c0_16 = arith.constant 0 : index
    %c0_17 = arith.constant 0 : index
    %25 = vector.load %arg7[%c0_16, %c0_17] : memref<128x128xbf16, #tpu.memory_space<vmem>>, vector<128x128xbf16>
    %cst_18 = arith.constant dense<0.000000e+00> : vector<16x128xf32>
    %26 = tpu.matmul %24, %25, %cst_18 {dimension_numbers = #tpu.dot_dimension_numbers<[1], [0], [0], [1], [0, 0, 1, 1], [], []>} : vector<16x128xbf16>, vector<128x128xbf16>, vector<16x128xf32> -> vector<16x128xf32>
    %c0_19 = arith.constant 0 : index
    %c0_20 = arith.constant 0 : index
    %27 = vector.load %arg8[%c0_19, %c0_20] : memref<1x128xf32, #tpu.memory_space<vmem>>, vector<1x128xf32>
    %28 = vector.broadcast %27 : vector<1x128xf32> to vector<16x128xf32>
    %29 = arith.addf %26, %28 : vector<16x128xf32>
    %cst_21 = arith.constant 0.000000e+00 : f32
    %30 = vector.broadcast %cst_21 : f32 to vector<16x128xf32>
    %31 = arith.maximumf %29, %30 : vector<16x128xf32>
    %32 = arith.truncf %31 : vector<16x128xf32> to vector<16x128xbf16>
    %c0_22 = arith.constant 0 : index
    %c0_23 = arith.constant 0 : index
    %33 = vector.load %arg9[%c0_22, %c0_23] : memref<128x128xbf16, #tpu.memory_space<vmem>>, vector<128x128xbf16>
    %cst_24 = arith.constant dense<0.000000e+00> : vector<16x128xf32>
    %34 = tpu.matmul %32, %33, %cst_24 {dimension_numbers = #tpu.dot_dimension_numbers<[1], [0], [0], [1], [0, 0, 1, 1], [], []>} : vector<16x128xbf16>, vector<128x128xbf16>, vector<16x128xf32> -> vector<16x128xf32>
    %c0_25 = arith.constant 0 : index
    %c0_26 = arith.constant 0 : index
    %35 = vector.load %arg10[%c0_25, %c0_26] : memref<1x128xf32, #tpu.memory_space<vmem>>, vector<1x128xf32>
    %36 = vector.broadcast %35 : vector<1x128xf32> to vector<16x128xf32>
    %37 = arith.addf %34, %36 : vector<16x128xf32>
    %38 = math.tanh %37 : vector<16x128xf32>
    %39 = arith.truncf %38 : vector<16x128xf32> to vector<16x128xbf16>
    %c0_27 = arith.constant 0 : index
    %c0_28 = arith.constant 0 : index
    %40 = vector.load %arg11[%c0_27, %c0_28] : memref<16x128xbf16, #tpu.memory_space<vmem>>, vector<16x128xbf16>
    tpu.vector_store %arg11[%c0_27, %c0_28], %39 {strides = array<i32>} : memref<16x128xbf16, #tpu.memory_space<vmem>>, vector<16x128xbf16>,
    return
  }
  func.func @transform_0(%arg0: i32) -> (i32, i32) {
    %c0_i32 = arith.constant 0 : i32
    %c0_i32_0 = arith.constant 0 : i32
    return %arg0, %c0_i32 : i32, i32
  }
  func.func @transform_1(%arg0: i32) -> (i32, i32) {
    %c0_i32 = arith.constant 0 : i32
    %c0_i32_0 = arith.constant 0 : i32
    return %arg0, %c0_i32 : i32, i32
  }
  func.func @transform_2(%arg0: i32) -> (i32, i32) {
    %c0_i32 = arith.constant 0 : i32
    %c0_i32_0 = arith.constant 0 : i32
    %c0_i32_1 = arith.constant 0 : i32
    return %c0_i32, %c0_i32_0 : i32, i32
  }
  func.func @transform_3(%arg0: i32) -> (i32, i32) {
    %c0_i32 = arith.constant 0 : i32
    %c0_i32_0 = arith.constant 0 : i32
    %c0_i32_1 = arith.constant 0 : i32
    return %c0_i32, %c0_i32_0 : i32, i32
  }
  func.func @transform_4(%arg0: i32) -> (i32, i32) {
    %c0_i32 = arith.constant 0 : i32
    %c0_i32_0 = arith.constant 0 : i32
    %c0_i32_1 = arith.constant 0 : i32
    return %c0_i32, %c0_i32_0 : i32, i32
  }
  func.func @transform_5(%arg0: i32) -> (i32, i32) {
    %c0_i32 = arith.constant 0 : i32
    %c0_i32_0 = arith.constant 0 : i32
    %c0_i32_1 = arith.constant 0 : i32
    return %c0_i32, %c0_i32_0 : i32, i32
  }
  func.func @transform_6(%arg0: i32) -> (i32, i32) {
    %c0_i32 = arith.constant 0 : i32
    %c0_i32_0 = arith.constant 0 : i32
    %c0_i32_1 = arith.constant 0 : i32
    return %c0_i32, %c0_i32_0 : i32, i32
  }
  func.func @transform_7(%arg0: i32) -> (i32, i32) {
    %c0_i32 = arith.constant 0 : i32
    %c0_i32_0 = arith.constant 0 : i32
    %c0_i32_1 = arith.constant 0 : i32
    return %c0_i32, %c0_i32_0 : i32, i32
  }
  func.func @transform_8(%arg0: i32) -> (i32, i32) {
    %c0_i32 = arith.constant 0 : i32
    %c0_i32_0 = arith.constant 0 : i32
    %c0_i32_1 = arith.constant 0 : i32
    return %c0_i32, %c0_i32_0 : i32, i32
  }
  func.func @transform_9(%arg0: i32) -> (i32, i32) {
    %c0_i32 = arith.constant 0 : i32
    %c0_i32_0 = arith.constant 0 : i32
    %c0_i32_1 = arith.constant 0 : i32
    return %c0_i32, %c0_i32_0 : i32, i32
  }
  func.func @transform_10(%arg0: i32) -> (i32, i32) {
    %c0_i32 = arith.constant 0 : i32
    %c0_i32_0 = arith.constant 0 : i32
    return %arg0, %c0_i32 : i32, i32
  }
  func.func @transform_11(%arg0: i32) -> (i32, i32) {
    %c0_i32 = arith.constant 0 : i32
    %c0_i32_0 = arith.constant 0 : i32
    return %arg0, %c0_i32 : i32, i32
  }
}

module attributes {stable_mosaic.version = 11 : i64} {
  func.func @vae_forward_kernel(%arg0: i32, %arg1: memref<16x128xbf16, #tpu.memory_space<vmem>>, %arg2: memref<16x128xbf16, #tpu.memory_space<vmem>>, %arg3: memref<128x128xbf16, #tpu.memory_space<vmem>>, %arg4: memref<1x128xf32, #tpu.memory_space<vmem>>, %arg5: memref<128x256xbf16, #tpu.memory_space<vmem>>, %arg6: memref<1x256xf32, #tpu.memory_space<vmem>>, %arg7: memref<128x128xbf16, #tpu.memory_space<vmem>>, %arg8: memref<1x128xf32, #tpu.memory_space<vmem>>, %arg9: memref<128x128xbf16, #tpu.memory_space<vmem>>, %arg10: memref<1x128xf32, #tpu.memory_space<vmem>>, %arg11: memref<16x128xbf16, #tpu.memory_space<vmem>>, %arg12: memref<16x256xf32, #tpu.memory_space<vmem>>) attributes {dimension_semantics = [#tpu.dimension_semantics<parallel>], iteration_bounds = array<i64: 1>, scalar_prefetch = 0 : i64, scratch_operands = 0 : i64, tpu.core_type = #tpu.core_type<tc>, window_params = [{transform_indices = @transform_0, window_bounds = array<i64: 16, 128>}, {transform_indices = @transform_1, window_bounds = array<i64: 16, 128>}, {pipeline_mode = #tpu.pipeline_mode<synchronous>, transform_indices = @transform_2, window_bounds = array<i64: 128, 128>}, {pipeline_mode = #tpu.pipeline_mode<synchronous>, transform_indices = @transform_3, window_bounds = array<i64: 1, 128>}, {pipeline_mode = #tpu.pipeline_mode<synchronous>, transform_indices = @transform_4, window_bounds = array<i64: 128, 256>}, {pipeline_mode = #tpu.pipeline_mode<synchronous>, transform_indices = @transform_5, window_bounds = array<i64: 1, 256>}, {pipeline_mode = #tpu.pipeline_mode<synchronous>, transform_indices = @transform_6, window_bounds = array<i64: 128, 128>}, {pipeline_mode = #tpu.pipeline_mode<synchronous>, transform_indices = @transform_7, window_bounds = array<i64: 1, 128>}, {pipeline_mode = #tpu.pipeline_mode<synchronous>, transform_indices = @transform_8, window_bounds = array<i64: 128, 128>}, {pipeline_mode = #tpu.pipeline_mode<synchronous>, transform_indices = @transform_9, window_bounds = array<i64: 1, 128>}, {transform_indices = @transform_10, window_bounds = array<i64: 16, 128>}, {transform_indices = @transform_11, window_bounds = array<i64: 16, 256>}]} {
    %c0 = arith.constant 0 : index
    %c0_0 = arith.constant 0 : index
    %0 = vector.load %arg1[%c0, %c0_0] : memref<16x128xbf16, #tpu.memory_space<vmem>>, vector<16x128xbf16>
    %c0_1 = arith.constant 0 : index
    %c0_2 = arith.constant 0 : index
    %1 = vector.load %arg2[%c0_1, %c0_2] : memref<16x128xbf16, #tpu.memory_space<vmem>>, vector<16x128xbf16>
    %2 = arith.extf %1 : vector<16x128xbf16> to vector<16x128xf32>
    %c0_3 = arith.constant 0 : index
    %c0_4 = arith.constant 0 : index
    %3 = vector.load %arg3[%c0_3, %c0_4] : memref<128x128xbf16, #tpu.memory_space<vmem>>, vector<128x128xbf16>
    %cst = arith.constant dense<0.000000e+00> : vector<16x128xf32>
    %4 = tpu.matmul %0, %3, %cst {dimension_numbers = #tpu.dot_dimension_numbers<[1], [0], [0], [1], [0, 0, 1, 1], [], []>} : vector<16x128xbf16>, vector<128x128xbf16>, vector<16x128xf32> -> vector<16x128xf32>
    %c0_5 = arith.constant 0 : index
    %c0_6 = arith.constant 0 : index
    %5 = vector.load %arg4[%c0_5, %c0_6] : memref<1x128xf32, #tpu.memory_space<vmem>>, vector<1x128xf32>
    %6 = vector.broadcast %5 : vector<1x128xf32> to vector<16x128xf32>
    %7 = arith.addf %4, %6 : vector<16x128xf32>
    %cst_7 = arith.constant 0.000000e+00 : f32
    %8 = vector.broadcast %cst_7 : f32 to vector<16x128xf32>
    %9 = arith.maximumf %7, %8 : vector<16x128xf32>
    %10 = arith.truncf %9 : vector<16x128xf32> to vector<16x128xbf16>
    %c0_8 = arith.constant 0 : index
    %c0_9 = arith.constant 0 : index
    %11 = vector.load %arg5[%c0_8, %c0_9] : memref<128x256xbf16, #tpu.memory_space<vmem>>, vector<128x256xbf16>
    %cst_10 = arith.constant dense<0.000000e+00> : vector<16x256xf32>
    %12 = tpu.matmul %10, %11, %cst_10 {dimension_numbers = #tpu.dot_dimension_numbers<[1], [0], [0], [1], [0, 0, 1, 1], [], []>} : vector<16x128xbf16>, vector<128x256xbf16>, vector<16x256xf32> -> vector<16x256xf32>
    %c0_11 = arith.constant 0 : index
    %c0_12 = arith.constant 0 : index
    %13 = vector.load %arg6[%c0_11, %c0_12] : memref<1x256xf32, #tpu.memory_space<vmem>>, vector<1x256xf32>
    %14 = vector.broadcast %13 : vector<1x256xf32> to vector<16x256xf32>
    %15 = arith.addf %12, %14 : vector<16x256xf32>
    %c0_13 = arith.constant 0 : index
    %c0_14 = arith.constant 0 : index
    %16 = vector.load %arg12[%c0_13, %c0_14] : memref<16x256xf32, #tpu.memory_space<vmem>>, vector<16x256xf32>
    tpu.vector_store %arg12[%c0_13, %c0_14], %15 {strides = array<i32>} : memref<16x256xf32, #tpu.memory_space<vmem>>, vector<16x256xf32>,
    %17 = vector.extract_strided_slice %15 {offsets = [0, 0], sizes = [16, 128], strides = [1, 1]} : vector<16x256xf32> to vector<16x128xf32>
    %18 = vector.extract_strided_slice %15 {offsets = [0, 128], sizes = [16, 128], strides = [1, 1]} : vector<16x256xf32> to vector<16x128xf32>
    %cst_15 = arith.constant 5.000000e-01 : f32
    %19 = vector.broadcast %cst_15 : f32 to vector<16x128xf32>
    %20 = arith.mulf %19, %18 : vector<16x128xf32>
    %21 = math.exp %20 : vector<16x128xf32>
    %22 = arith.mulf %2, %21 : vector<16x128xf32>
    %23 = arith.addf %17, %22 : vector<16x128xf32>
    %24 = arith.truncf %23 : vector<16x128xf32> to vector<16x128xbf16>
    %c0_16 = arith.constant 0 : index
    %c0_17 = arith.constant 0 : index
    %25 = vector.load %arg7[%c0_16, %c0_17] : memref<128x128xbf16, #tpu.memory_space<vmem>>, vector<128x128xbf16>
    %cst_18 = arith.constant dense<0.000000e+00> : vector<16x128xf32>
    %26 = tpu.matmul %24, %25, %cst_18 {dimension_numbers = #tpu.dot_dimension_numbers<[1], [0], [0], [1], [0, 0, 1, 1], [], []>} : vector<16x128xbf16>, vector<128x128xbf16>, vector<16x128xf32> -> vector<16x128xf32>
    %c0_19 = arith.constant 0 : index
    %c0_20 = arith.constant 0 : index
    %27 = vector.load %arg8[%c0_19, %c0_20] : memref<1x128xf32, #tpu.memory_space<vmem>>, vector<1x128xf32>
    %28 = vector.broadcast %27 : vector<1x128xf32> to vector<16x128xf32>
    %29 = arith.addf %26, %28 : vector<16x128xf32>
    %cst_21 = arith.constant 0.000000e+00 : f32
    %30 = vector.broadcast %cst_21 : f32 to vector<16x128xf32>
    %31 = arith.maximumf %29, %30 : vector<16x128xf32>
    %32 = arith.truncf %31 : vector<16x128xf32> to vector<16x128xbf16>
    %c0_22 = arith.constant 0 : index
    %c0_23 = arith.constant 0 : index
    %33 = vector.load %arg9[%c0_22, %c0_23] : memref<128x128xbf16, #tpu.memory_space<vmem>>, vector<128x128xbf16>
    %cst_24 = arith.constant dense<0.000000e+00> : vector<16x128xf32>
    %34 = tpu.matmul %32, %33, %cst_24 {dimension_numbers = #tpu.dot_dimension_numbers<[1], [0], [0], [1], [0, 0, 1, 1], [], []>} : vector<16x128xbf16>, vector<128x128xbf16>, vector<16x128xf32> -> vector<16x128xf32>
    %c0_25 = arith.constant 0 : index
    %c0_26 = arith.constant 0 : index
    %35 = vector.load %arg10[%c0_25, %c0_26] : memref<1x128xf32, #tpu.memory_space<vmem>>, vector<1x128xf32>
    %36 = vector.broadcast %35 : vector<1x128xf32> to vector<16x128xf32>
    %37 = arith.addf %34, %36 : vector<16x128xf32>
    %38 = math.tanh %37 : vector<16x128xf32>
    %39 = arith.truncf %38 : vector<16x128xf32> to vector<16x128xbf16>
    %c0_27 = arith.constant 0 : index
    %c0_28 = arith.constant 0 : index
    %40 = vector.load %arg11[%c0_27, %c0_28] : memref<16x128xbf16, #tpu.memory_space<vmem>>, vector<16x128xbf16>
    tpu.vector_store %arg11[%c0_27, %c0_28], %39 {strides = array<i32>} : memref<16x128xbf16, #tpu.memory_space<vmem>>, vector<16x128xbf16>,
    return
  }
  func.func @transform_0(%arg0: i32) -> (i32, i32) {
    %c0_i32 = arith.constant 0 : i32
    %c0_i32_0 = arith.constant 0 : i32
    return %arg0, %c0_i32 : i32, i32
  }
  func.func @transform_1(%arg0: i32) -> (i32, i32) {
    %c0_i32 = arith.constant 0 : i32
    %c0_i32_0 = arith.constant 0 : i32
    return %arg0, %c0_i32 : i32, i32
  }
  func.func @transform_2(%arg0: i32) -> (i32, i32) {
    %c0_i32 = arith.constant 0 : i32
    %c0_i32_0 = arith.constant 0 : i32
    %c0_i32_1 = arith.constant 0 : i32
    return %c0_i32, %c0_i32_0 : i32, i32
  }
  func.func @transform_3(%arg0: i32) -> (i32, i32) {
    %c0_i32 = arith.constant 0 : i32
    %c0_i32_0 = arith.constant 0 : i32
    %c0_i32_1 = arith.constant 0 : i32
    return %c0_i32, %c0_i32_0 : i32, i32
  }
  func.func @transform_4(%arg0: i32) -> (i32, i32) {
    %c0_i32 = arith.constant 0 : i32
    %c0_i32_0 = arith.constant 0 : i32
    %c0_i32_1 = arith.constant 0 : i32
    return %c0_i32, %c0_i32_0 : i32, i32
  }
  func.func @transform_5(%arg0: i32) -> (i32, i32) {
    %c0_i32 = arith.constant 0 : i32
    %c0_i32_0 = arith.constant 0 : i32
    %c0_i32_1 = arith.constant 0 : i32
    return %c0_i32, %c0_i32_0 : i32, i32
  }
  func.func @transform_6(%arg0: i32) -> (i32, i32) {
    %c0_i32 = arith.constant 0 : i32
    %c0_i32_0 = arith.constant 0 : i32
    %c0_i32_1 = arith.constant 0 : i32
    return %c0_i32, %c0_i32_0 : i32, i32
  }
  func.func @transform_7(%arg0: i32) -> (i32, i32) {
    %c0_i32 = arith.constant 0 : i32
    %c0_i32_0 = arith.constant 0 : i32
    %c0_i32_1 = arith.constant 0 : i32
    return %c0_i32, %c0_i32_0 : i32, i32
  }
  func.func @transform_8(%arg0: i32) -> (i32, i32) {
    %c0_i32 = arith.constant 0 : i32
    %c0_i32_0 = arith.constant 0 : i32
    %c0_i32_1 = arith.constant 0 : i32
    return %c0_i32, %c0_i32_0 : i32, i32
  }
  func.func @transform_9(%arg0: i32) -> (i32, i32) {
    %c0_i32 = arith.constant 0 : i32
    %c0_i32_0 = arith.constant 0 : i32
    %c0_i32_1 = arith.constant 0 : i32
    return %c0_i32, %c0_i32_0 : i32, i32
  }
  func.func @transform_10(%arg0: i32) -> (i32, i32) {
    %c0_i32 = arith.constant 0 : i32
    %c0_i32_0 = arith.constant 0 : i32
    return %arg0, %c0_i32 : i32, i32
  }
  func.func @transform_11(%arg0: i32) -> (i32, i32) {
    %c0_i32 = arith.constant 0 : i32
    %c0_i32_0 = arith.constant 0 : i32
    return %arg0, %c0_i32 : i32, i32
  }
}

</mosaic_0001>

<bundles_post_ra>
// kernel: tpu_custom_call.1
= control target key start
LH: loop header
LB: loop body
LE: loop exit
PB: predicated region body
PF: predicated region fallthrough
CT: control target
= control target key end

     0   :  { %17 = vsyncpa [#allocation3], 0  ;;  %s1241_s0 = inlined_call_operand.hbm [shape: bf16[16,128], index: 0, kind: input, shape index: {}]   ;;  %s1242_s1 = inlined_call_operand.hbm [shape: bf16[16,128], index: 1, kind: input, shape index: {}]   ;;  %s1243_s2 = inlined_call_operand.hbm [shape: bf16[128,128], index: 2, kind: input, shape index: {}]   ;;  %s1244_s3 = inlined_call_operand.vmem [shape: f32[1,128], index: 3, kind: input, shape index: {}]   ;;  %s1245_s4 = inlined_call_operand.hbm [shape: bf16[128,256], index: 4, kind: input, shape index: {}]   ;;  %s1246_s5 = inlined_call_operand.vmem [shape: f32[1,256], index: 5, kind: input, shape index: {}]   ;;  %s1247_s6 = inlined_call_operand.hbm [shape: bf16[128,128], index: 6, kind: input, shape index: {}]   ;;  %s1248_s7 = inlined_call_operand.vmem [shape: f32[1,128], index: 7, kind: input, shape index: {}]   ;;  %s1249_s8 = inlined_call_operand.hbm [shape: bf16[128,128], index: 8, kind: input, shape index: {}]   ;;  %s1250_s9 = inlined_call_operand.vmem [shape: f32[1,128], index: 9, kind: input, shape index: {}]   ;;  %s1251_s10 = inlined_call_operand.hbm [shape: bf16[16,128], index: 10, kind: output, shape index: {0}]   ;;  %s1252_s11 = inlined_call_operand.hbm [shape: f32[16,256], index: 11, kind: output, shape index: {1}]  }
   0x1   :  { %18 = vsyncpa [#allocation6], 0 }
   0x2   :  { %19 = vsyncpa [#allocation9], 0 }
   0x3   :  { %20 = vsyncpa [#allocation12], 0 }
   0x4   :  { %21 = vsyncpa [#allocation4], 0 }
   0x5   :  { %22 = vsyncpa [#allocation15], 0  ;;  %s1080_s17 = smov [#allocation5]   ;;  %s1081_s19 = smov [#allocation8]  }
   0x6   :  { %s40_s18 = sshll.u32 %s1080_s17, 4  ;;  %s66_s20 = sshll.u32 %s1081_s19, 4  ;;  %s41_s18 = int_to_ptr.vmem [resolvable:$true] %s40_s18  ;;  %s67_s20 = int_to_ptr.vmem [resolvable:$true] %s66_s20 }
   0x7   :  { %s916_s21 = scalar_lea.vmem %s41_s18, 128  ;;  %p921_p1 = scmp.lt.s32.totalorder %s41_s18, %s41_s18 }
   0x8   :  { %p917_p0 = scmp.ne.s32.totalorder %s41_s18, %s916_s21  ;;  %p922_p2 = scmp.lt.s32.totalorder %s916_s21, %s916_s21 }
   0xa   :  { %p923_p3 = por %p922_p2, %p921_p1 }
   0xc   :  { %p924_p4 = pnand %p923_p3, %p917_p0 }
   0xe   :  { %927 = shalt.err (!%p924_p4)
}
   0xf   :  { %s1082_s22 = smov 64   ;;  %s1083_s23 = smov 4  }
  0x10   :  { %46 = dma.hbm_to_vmem [thread:$0]  %s1242_s1, 128, %s41_s18, [#allocation6], %s1082_s22, %s1082_s22, %s1083_s23  }
  0x11   :  { %s936_s26 = scalar_lea.vmem %s67_s20, 2048  ;;  %p941_p6 = scmp.lt.s32.totalorder %s67_s20, %s67_s20 }
  0x12   :  { %p937_p5 = scmp.ne.s32.totalorder %s67_s20, %s936_s26  ;;  %p942_p7 = scmp.lt.s32.totalorder %s936_s26, %s936_s26 }
  0x14   :  { %p943_p8 = por %p942_p7, %p941_p6 }
  0x16   :  { %p944_p9 = pnand %p943_p8, %p937_p5 }
  0x18   :  { %947 = shalt.err (!%p944_p9)
}
  0x19   :  { %s1084_s27 = smov 128   ;;  %s1085_s28 = smov 8  }
  0x1a   :  { %72 = dma.hbm_to_vmem [thread:$0]  %s1245_s4, 2048, %s67_s20, [#allocation9], %s1084_s27, %s1084_s27, %s1085_s28  }
  0x1b   :  { %s1086_s12 = smov [#allocation2]   ;;  %s1087_s14 = smov [#allocation7]  }
  0x1c   :  { %s28_s13 = sshll.u32 %s1086_s12, 4  ;;  %s52_s15 = sshll.u32 %s1087_s14, 4  ;;  %s29_s13 = int_to_ptr.vmem [resolvable:$true] %s28_s13  ;;  %s53_s15 = int_to_ptr.vmem [resolvable:$true] %s52_s15 }
  0x1d   :  { %s956_s1 = scalar_lea.vmem %s29_s13, 128  ;;  %p961_p11 = scmp.lt.s32.totalorder %s29_s13, %s29_s13 }
  0x1e   :  { %p957_p10 = scmp.ne.s32.totalorder %s29_s13, %s956_s1  ;;  %p962_p12 = scmp.lt.s32.totalorder %s956_s1, %s956_s1 }
  0x20   :  { %p963_p13 = por %p962_p12, %p961_p11 }
  0x22   :  { %p964_p0 = pnand %p963_p13, %p957_p10 }
  0x24   :  { %967 = shalt.err (!%p964_p0)
}
  0x25   :  { %34 = dma.hbm_to_vmem [thread:$0]  %s1241_s0, 128, %s29_s13, [#allocation3], %s1082_s22, %s1082_s22, %s1083_s23  }
  0x26   :  { %s976_s4 = scalar_lea.vmem %s53_s15, 1024  ;;  %p981_p2 = scmp.lt.s32.totalorder %s53_s15, %s53_s15 }
  0x27   :  { %p977_p1 = scmp.ne.s32.totalorder %s53_s15, %s976_s4  ;;  %p982_p3 = scmp.lt.s32.totalorder %s976_s4, %s976_s4 }
  0x29   :  { %p983_p4 = por %p982_p3, %p981_p2 }
  0x2b   :  { %p984_p5 = pnand %p983_p4, %p977_p1 }
  0x2d   :  { %987 = shalt.err (!%p984_p5)
}
  0x2e   :  { %58 = dma.hbm_to_vmem [thread:$0]  %s1243_s2, 1024, %s53_s15, [#allocation6], %s1082_s22, %s1082_s22, %s1083_s23  }
  0x2f   :  { %s1088_s20 = smov [#allocation10]   ;;  %s1089_s24 = smov [#allocation11]  }
  0x30   :  { %s80_s21 = sshll.u32 %s1088_s20, 4  ;;  %s94_s25 = sshll.u32 %s1089_s24, 4  ;;  %s81_s21 = int_to_ptr.vmem [resolvable:$true] %s80_s21  ;;  %s95_s25 = int_to_ptr.vmem [resolvable:$true] %s94_s25 }
  0x31   :  { %s996_s0 = scalar_lea.vmem %s81_s21, 1024  ;;  %p1001_p7 = scmp.lt.s32.totalorder %s81_s21, %s81_s21 }
  0x32   :  { %p997_p6 = scmp.ne.s32.totalorder %s81_s21, %s996_s0  ;;  %p1002_p8 = scmp.lt.s32.totalorder %s996_s0, %s996_s0 }
  0x34   :  { %p1003_p9 = por %p1002_p8, %p1001_p7 }
  0x36   :  { %p1004_p10 = pnand %p1003_p9, %p997_p6 }
  0x38   :  { %1007 = shalt.err (!%p1004_p10)
}
  0x39   :  { %86 = dma.hbm_to_vmem [thread:$0]  %s1247_s6, 1024, %s81_s21, [#allocation9], %s1082_s22, %s1082_s22, %s1083_s23  }
  0x3a   :  { %s1016_s2 = scalar_lea.vmem %s95_s25, 1024  ;;  %p1021_p12 = scmp.lt.s32.totalorder %s95_s25, %s95_s25 }
  0x3b   :  { %p1017_p11 = scmp.ne.s32.totalorder %s95_s25, %s1016_s2  ;;  %p1022_p13 = scmp.lt.s32.totalorder %s1016_s2, %s1016_s2 }
  0x3d   :  { %p1023_p0 = por %p1022_p13, %p1021_p12 }
  0x3f   :  { %p1024_p1 = pnand %p1023_p0, %p1017_p11 }
  0x41   :  { %1027 = shalt.err (!%p1024_p1)
}
  0x42   :  { %100 = dma.hbm_to_vmem [thread:$0]  %s1249_s8, 1024, %s95_s25, [#allocation12], %s1082_s22, %s1082_s22, %s1083_s23  }
  0x43   :  { %1068 = dma.done.wait [#allocation3], 128  }
  0x44   :  { %1069 = vsyncadd [#allocation3], 4294967168 }
  0x45   :  { %1070 = dma.done.wait [#allocation6], 1152  }
  0x46   :  { %1071 = vsyncadd [#allocation6], 4294966144 }
  0x47   :  { %1072 = dma.done.wait [#allocation9], 3072  }
  0x48   :  { %1073 = vsyncadd [#allocation9], 4294964224 }
  0x49   :  { %1074 = dma.done.wait [#allocation12], 1024  }
  0x4a   :  { %1075 = vsyncadd [#allocation12], 4294966272  ;;  %v1090_v0 = vmov 0.0   ;;  %vm1091_vm0 = vmmov 0   ;;  %v851_v1 = vld [vmem:[#allocation7 + $0x38] sm:$0xff]   ;;  %v852_v2 = vld [vmem:[#allocation7 + $0x30] sm:$0xff]   ;;  %v267_v50 = vlaneseq }
  0x4b   :  { %774 = vmatprep.subr.bf16.mxu0 %v1090_v0  ;;  %790 = vmatprep.mubr.msk.bf16.mxu0 %vm1091_vm0, %v1090_v0  ;;  %v853_v3 = vld [vmem:[#allocation7 + $0x28] sm:$0xff]   ;;  %v854_v4 = vld [vmem:[#allocation7 + $0x20] sm:$0xff]   ;;  %v860_v5 = vld [vmem:[#allocation8 + $0x74] ss:$8 sps:$4 sm:$0xff]   ;;  %v1092_v26 = vmov 0   ;;  %s1093_s13 = smov [#allocation14]  }
  0x4c   :  { %775 = vmatpush3.bf16.msra.mxu0 %v851_v1  ;;  %v862_v6 = vld [vmem:[#allocation8 + $0x70] ss:$8 sps:$4 sm:$0xff]   ;;  %357 = vmatprep.subr.bf16.mxu1 %v860_v5  ;;  %v863_v7 = vld [vmem:[#allocation8 + $0x64] ss:$8 sps:$4 sm:$0xff]   ;;  %v865_v8 = vld [vmem:[#allocation8 + $0x60] ss:$8 sps:$4 sm:$0xff]  }
  0x4d   :  { %776 = vmatprep.subr.bf16.mxu0 %v1090_v0  ;;  %358 = vmatpush1.bf16.msra.mxu1 %v862_v6  ;;  %v866_v9 = vld [vmem:[#allocation8 + $0x54] ss:$8 sps:$4 sm:$0xff]   ;;  %v868_v12 = vld [vmem:[#allocation8 + $0x50] ss:$8 sps:$4 sm:$0xff]   ;;  %v869_v13 = vld [vmem:[#allocation8 + $0x44] ss:$8 sps:$4 sm:$0xff]  }
  0x4e   :  { %359 = vmatprep.subr.bf16.mxu1 %v863_v7  ;;  %v855_v10 = vld [vmem:[#allocation7 + $0x18] sm:$0xff]   ;;  %v856_v11 = vld [vmem:[#allocation7 + $0x10] sm:$0xff]   ;;  %v871_v14 = vld [vmem:[#allocation8 + $0x40] ss:$8 sps:$4 sm:$0xff]   ;;  %389 = vmatprep.mubr.bf16.mxu1 %v1092_v26  ;;  %v268_v51 = vshrl.u32 %v267_v50, 7  ;;  %s671_s14 = sshll.u32 %s1093_s13, 4  ;;  %s672_s14 = int_to_ptr.vmem [resolvable:$true] %s671_s14 }
  0x4f   :  { %v872_v15 = vld [vmem:[#allocation8 + $0x34] ss:$8 sps:$4 sm:$0xff]   ;;  %v857_v16 = vld [vmem:[#allocation7 + $0x8] sm:$0xff]   ;;  %v874_v17 = vld [vmem:[#allocation8 + $0x30] ss:$8 sps:$4 sm:$0xff]   ;;  %s1028_s15 = scalar_lea.vmem %s672_s14, 512  ;;  %p1033_p3 = scmp.lt.s32.totalorder %s672_s14, %s672_s14 }
  0x50   :  { %777 = vmatpush3.bf16.msra.mxu0 %v852_v2  ;;  %v875_v18 = vld [vmem:[#allocation8 + $0x24] ss:$8 sps:$4 sm:$0xff]   ;;  %v859_v20 = vld [vmem:[#allocation2] sm:$0xff]   ;;  %v877_v21 = vld [vmem:[#allocation8 + $0x20] ss:$8 sps:$4 sm:$0xff]   ;;  %v269_v52 = vsub.s32 0, %v268_v51  ;;  %p1029_p2 = scmp.ne.s32.totalorder %s672_s14, %s1028_s15  ;;  %p1034_p4 = scmp.lt.s32.totalorder %s1028_s15, %s1028_s15 }
  0x51   :  { %778 = vmatprep.subr.bf16.mxu0 %v1090_v0  ;;  %360 = vmatpush1.bf16.msra.mxu1 %v865_v8  ;;  %v858_v19 = vld [vmem:[#allocation7] sm:$0xff]   ;;  %v878_v22 = vld [vmem:[#allocation8 + $0x14] ss:$8 sps:$4 sm:$0xff]   ;;  %v880_v23 = vld [vmem:[#allocation8 + $0x10] ss:$8 sps:$4 sm:$0xff]   ;;  %v273_v54 = vsub.s32 1, %v268_v51 }
  0x52   :  { %361 = vmatprep.subr.bf16.mxu1 %v866_v9  ;;  %v881_v24 = vld [vmem:[#allocation8 + $0x4] ss:$8 sps:$4 sm:$0xff]   ;;  %v883_v25 = vld [vmem:[#allocation8] ss:$8 sps:$4 sm:$0xff]   ;;  %v690_v27 = vld [vmem:[%s1244_s3] ss:$0 sm:$0xff]  ;;  %p1035_p5 = por %p1034_p4, %p1033_p3 }
  0x53   :  { %v884_v37 = vld [vmem:[#allocation10 + $0x38] sm:$0xff]   ;;  %v885_v38 = vld [vmem:[#allocation10 + $0x30] sm:$0xff]   ;;  %v886_v39 = vld [vmem:[#allocation10 + $0x28] sm:$0xff]  }
  0x54   :  { %779 = vmatpush3.bf16.msra.mxu0 %v853_v3  ;;  %v887_v40 = vld [vmem:[#allocation10 + $0x20] sm:$0xff]   ;;  %v888_v41 = vld [vmem:[#allocation10 + $0x18] sm:$0xff]   ;;  %v889_v42 = vld [vmem:[#allocation10 + $0x10] sm:$0xff]   ;;  %p1036_p6 = pnand %p1035_p5, %p1029_p2 }
  0x55   :  { %780 = vmatprep.subr.bf16.mxu0 %v1090_v0  ;;  %362 = vmatpush1.bf16.msra.mxu1 %v868_v12  ;;  %v890_v43 = vld [vmem:[#allocation10 + $0x8] sm:$0xff]   ;;  %v891_v44 = vld [vmem:[#allocation10] sm:$0xff]   ;;  %v892_v45 = vld [vmem:[#allocation11 + $0x38] sm:$0xff]  }
  0x56   :  { %363 = vmatprep.subr.bf16.mxu1 %v869_v13  ;;  %v893_v46 = vld [vmem:[#allocation11 + $0x30] sm:$0xff]   ;;  %v894_v47 = vld [vmem:[#allocation11 + $0x28] sm:$0xff]   ;;  %v895_v48 = vld [vmem:[#allocation11 + $0x20] sm:$0xff]  }
  0x57   :  { %v896_v49 = vld [vmem:[#allocation11 + $0x18] sm:$0xff]   ;;  %v265_v53 = vld [vmem:[%s1246_s5] sm:$0x3] }
  0x58   :  { %781 = vmatpush3.bf16.msra.mxu0 %v854_v4  ;;  %v270_v55 = vrot.slane %v265_v53, %v269_v52  ;;  %v274_v56 = vrot.slane %v265_v53, %v273_v54  ;;  %v739_v6 = vld [vmem:[#allocation5] sm:$0xff]  }
  0x59   :  { %782 = vmatprep.subr.bf16.mxu0 %v1090_v0  ;;  %364 = vmatpush1.bf16.msra.mxu1 %v871_v14  ;;  %v740_v7 = vunpack.c.l.bf16 %v739_v6  ;;  %v741_v9 = vunpack.c.h.bf16 %v739_v6 }
  0x5a   :  { %365 = vmatprep.subr.bf16.mxu1 %v872_v15 }
  0x5c   :  { %783 = vmatpush3.bf16.msra.mxu0 %v855_v10 }
  0x5d   :  { %784 = vmatprep.subr.bf16.mxu0 %v1090_v0  ;;  %366 = vmatpush1.bf16.msra.mxu1 %v874_v17  ;;  %v898_v17 = vld [vmem:[#allocation11 + $0x8] sm:$0xff]  }
  0x5e   :  { %367 = vmatprep.subr.bf16.mxu1 %v875_v18  ;;  %v899_v18 = vld [vmem:[#allocation11] sm:$0xff]  }
  0x60   :  { %785 = vmatpush3.bf16.msra.mxu0 %v856_v11 }
  0x61   :  { %786 = vmatprep.subr.bf16.mxu0 %v1090_v0  ;;  %368 = vmatpush1.bf16.msra.mxu1 %v877_v21 }
  0x62   :  { %369 = vmatprep.subr.bf16.mxu1 %v878_v22 }
  0x64   :  { %787 = vmatpush3.bf16.msra.mxu0 %v857_v16  ;;  %v897_v16 = vld [vmem:[#allocation11 + $0x10] sm:$0xff]  }
  0x65   :  { %788 = vmatprep.subr.bf16.mxu0 %v1090_v0  ;;  %370 = vmatpush1.bf16.msra.mxu1 %v880_v23 }
  0x66   :  { %371 = vmatprep.subr.bf16.mxu1 %v881_v24 }
  0x68   :  { %789 = vmatpush3.bf16.msra.mxu0 %v858_v19  ;;  %v716_v19 = vld [vmem:[%s1248_s7] ss:$0 sm:$0xff] }
  0x69   :  { %794 = vmatprep.subr.bf16.mxu0 %v1090_v0  ;;  %372 = vmatpush1.bf16.msra.mxu1 %v883_v25 }
  0x6a   :  { %814 = vmatprep.subr.bf16.mxu1 %v1090_v0 }
  0x6b   :  { %791 = vmatmul.mubr.bf16.vlgmr.msra.gmra.mxu0 %v859_v20 }
  0x6c   :  { %810 = vmatprep.mubr.msk.bf16.mxu0 %vm1091_vm0, %v1090_v0  ;;  %795 = vmatpush3.bf16.msra.mxu0 %v884_v37 }
  0x6d   :  { %796 = vmatprep.subr.bf16.mxu0 %v1090_v0 }
  0x70   :  { %797 = vmatpush3.bf16.msra.mxu0 %v885_v38 }
  0x71   :  { %798 = vmatprep.subr.bf16.mxu0 %v1090_v0 }
  0x74   :  { %799 = vmatpush3.bf16.msra.mxu0 %v886_v39 }
  0x75   :  { %800 = vmatprep.subr.bf16.mxu0 %v1090_v0 }
  0x78   :  { %801 = vmatpush3.bf16.msra.mxu0 %v887_v40 }
  0x79   :  { %802 = vmatprep.subr.bf16.mxu0 %v1090_v0 }
  0x7c   :  { %803 = vmatpush3.bf16.msra.mxu0 %v888_v41 }
  0x7d   :  { %804 = vmatprep.subr.bf16.mxu0 %v1090_v0 }
  0x80   :  { %805 = vmatpush3.bf16.msra.mxu0 %v889_v42 }
  0x81   :  { %806 = vmatprep.subr.bf16.mxu0 %v1090_v0 }
  0x84   :  { %807 = vmatpush3.bf16.msra.mxu0 %v890_v43 }
  0x85   :  { %808 = vmatprep.subr.bf16.mxu0 %v1090_v0 }
  0x88   :  { %809 = vmatpush3.bf16.msra.mxu0 %v891_v44 }
 0x12b   :  { %v239_v28 = vpop.f32.mrf.mxu0 }
 0x12c   :  { %v240_v30 = vadd.f32 %v690_v27, %v239_v28 }
 0x12d   :  { %v792_v29 = vpop.f32.mrf.mxu0 }
 0x12e   :  { %v246_v34 = vmax.f32 %v240_v30, 0.0 }
 0x12f   :  { %v242_v31 = vpop.f32.mrf.mxu0 }
 0x130   :  { %v243_v32 = vadd.f32 %v690_v27, %v242_v31 }
 0x131   :  { %v793_v33 = vpop.f32.mrf.mxu0 }
 0x132   :  { %v247_v35 = vmax.f32 %v243_v32, 0.0 }
 0x134   :  { %v248_v36 = vpack.c.bf16 %v247_v35, %v246_v34 }
 0x136   :  { %390 = vmatmul.mubr.bf16.vlgmr.msra.gmra.mxu1 %v248_v36 }
 0x137   :  { %830 = vmatprep.mubr.msk.bf16.mxu1 %vm1091_vm0, %v1090_v0  ;;  %815 = vmatpush3.bf16.msra.mxu1 %v892_v45 }
 0x138   :  { %816 = vmatprep.subr.bf16.mxu1 %v1090_v0 }
 0x13b   :  { %817 = vmatpush3.bf16.msra.mxu1 %v893_v46 }
 0x13c   :  { %818 = vmatprep.subr.bf16.mxu1 %v1090_v0 }
 0x13f   :  { %819 = vmatpush3.bf16.msra.mxu1 %v894_v47 }
 0x140   :  { %820 = vmatprep.subr.bf16.mxu1 %v1090_v0 }
 0x143   :  { %821 = vmatpush3.bf16.msra.mxu1 %v895_v48 }
 0x144   :  { %822 = vmatprep.subr.bf16.mxu1 %v1090_v0 }
 0x147   :  { %823 = vmatpush3.bf16.msra.mxu1 %v896_v49 }
 0x148   :  { %824 = vmatprep.subr.bf16.mxu1 %v1090_v0 }
 0x14b   :  { %825 = vmatpush3.bf16.msra.mxu1 %v897_v16 }
 0x14c   :  { %826 = vmatprep.subr.bf16.mxu1 %v1090_v0 }
 0x14f   :  { %827 = vmatpush3.bf16.msra.mxu1 %v898_v17 }
 0x150   :  { %828 = vmatprep.subr.bf16.mxu1 %v1090_v0 }
 0x153   :  { %829 = vmatpush3.bf16.msra.mxu1 %v899_v18 }
 0x1f6   :  { %v391_v57 = vpop.f32.mrf.mxu1 }
 0x1f7   :  { %v392_v58 = vadd.f32 %v391_v57, %v270_v55 }
 0x1f8   :  { %v393_v59 = vpop.f32.mrf.mxu1 }
 0x1f9   :  { %400 = vst [vmem:[#allocation14] sm:$0xff] %v392_v58  ;;  %v394_v60 = vadd.f32 %v393_v59, %v274_v56 }
 0x1fa   :  { %v395_v61 = vpop.f32.mrf.mxu1 }
 0x1fb   :  { %401 = vst [vmem:[#allocation14 + $0x8] sm:$0xff] %v394_v60  ;;  %v404_v62 = vmul.f32 0.5, %v394_v60  ;;  %v396_v63 = vadd.f32 %v395_v61, %v270_v55 }
 0x1fc   :  { %v397_v1 = vpop.f32.mrf.mxu1 }
 0x1fd   :  { %v406_v2 = vmul.f32 1.442695, %v404_v62  ;;  %402 = vst [vmem:[#allocation14 + $0x10] sm:$0xff] %v396_v63  ;;  %v398_v3 = vadd.f32 %v397_v1, %v274_v56 }
 0x1ff   :  { %900 = vpow2.f32 %v406_v2  ;;  %403 = vst [vmem:[#allocation14 + $0x18] sm:$0xff] %v398_v3  ;;  %v405_v4 = vmul.f32 0.5, %v398_v3 }
 0x201   :  { %v408_v5 = vmul.f32 1.442695, %v405_v4 }
 0x203   :  { %902 = vpow2.f32 %v408_v5 }
 0x20c   :  { %v901_v8 = vpop.eup %900 }
 0x20d   :  { %v410_v10 = vmul.f32 %v901_v8, %v740_v7 }
 0x20f   :  { %v412_v13 = vadd.f32 %v410_v10, %v392_v58 }
 0x210   :  { %v903_v11 = vpop.eup %902 }
 0x211   :  { %v411_v12 = vmul.f32 %v903_v11, %v741_v9 }
 0x213   :  { %v413_v14 = vadd.f32 %v411_v12, %v396_v63 }
 0x215   :  { %v414_v15 = vpack.c.bf16 %v413_v14, %v412_v13 }
 0x217   :  { %811 = vmatmul.mubr.bf16.vlgmr.msra.gmra.mxu0 %v414_v15 }
 0x2d7   :  { %v520_v20 = vpop.f32.mrf.mxu0 }
 0x2d8   :  { %v521_v22 = vadd.f32 %v716_v19, %v520_v20 }
 0x2d9   :  { %v812_v21 = vpop.f32.mrf.mxu0 }
 0x2da   :  { %v527_v26 = vmax.f32 %v521_v22, 0.0 }
 0x2db   :  { %v523_v23 = vpop.f32.mrf.mxu0 }
 0x2dc   :  { %v524_v24 = vadd.f32 %v716_v19, %v523_v23 }
 0x2dd   :  { %v813_v25 = vpop.f32.mrf.mxu0 }
 0x2de   :  { %v528_v27 = vmax.f32 %v524_v24, 0.0 }
 0x2e0   :  { %v529_v28 = vpack.c.bf16 %v528_v27, %v527_v26 }
 0x2e2   :  { %831 = vmatmul.mubr.bf16.vlgmr.msra.gmra.mxu1 %v529_v28 }
 0x2e3   :  { %1039 = shalt.err (!%p1036_p6)
}
 0x2e4   :  { %s1094_s7 = smov 256   ;;  %s1095_s1 = smov 16   ;;  %v725_v0 = vld [vmem:[%s1250_s9] ss:$0 sm:$0xff] }
 0x2e5   :  { %677 = dma.vmem_to_hbm [thread:$0]  %s672_s14, 512, %s1252_s11, [#allocation15], %s1094_s7, %s1094_s7, %s1095_s1  }
 0x2e6   :  { %s1096_s19 = smov [#allocation13]  }
 0x2e7   :  { %s659_s20 = sshll.u32 %s1096_s19, 4  ;;  %s660_s20 = int_to_ptr.vmem [resolvable:$true] %s659_s20 }
 0x2e8   :  { %s1048_s11 = scalar_lea.vmem %s660_s20, 128  ;;  %p1053_p8 = scmp.lt.s32.totalorder %s660_s20, %s660_s20 }
 0x2e9   :  { %p1049_p7 = scmp.ne.s32.totalorder %s660_s20, %s1048_s11  ;;  %p1054_p9 = scmp.lt.s32.totalorder %s1048_s11, %s1048_s11 }
 0x2eb   :  { %p1055_p10 = por %p1054_p9, %p1053_p8 }
 0x2ed   :  { %p1056_p11 = pnand %p1055_p10, %p1049_p7 }
 0x3a2   :  { %v635_v29 = vpop.f32.mrf.mxu1 }
 0x3a3   :  { %v636_v30 = vadd.f32 %v725_v0, %v635_v29 }
 0x3a4   :  { %v832_v31 = vpop.f32.mrf.mxu1 }
 0x3a5   :  { %904 = vtanh.f32 %v636_v30 }
 0x3a6   :  { %v638_v32 = vpop.f32.mrf.mxu1 }
 0x3a7   :  { %v639_v33 = vadd.f32 %v725_v0, %v638_v32 }
 0x3a8   :  { %v833_v34 = vpop.f32.mrf.mxu1 }
 0x3a9   :  { %906 = vtanh.f32 %v639_v33 }
 0x3b2   :  { %v905_v35 = vpop.eup %904 }
 0x3b6   :  { %v907_v36 = vpop.eup %906 }
 0x3b7   :  { %v745_v37 = vpack.c.bf16 %v907_v36, %v905_v35 }
 0x3b9   :  { %746 = vst [vmem:[#allocation13] sm:$0xff] %v745_v37  }
 0x3ba   :  { %1059 = shalt.err (!%p1056_p11)
}
 0x3bb   :  { %665 = dma.vmem_to_hbm [thread:$0]  %s660_s20, 128, %s1251_s10, [#allocation4], %s1082_s22, %s1082_s22, %s1083_s23  }
 0x3bc   :  { %1076 = dma.done.wait [#allocation4], 128  }
 0x3bd   :  { %1077 = vsyncadd [#allocation4], 4294967168 }
 0x3be   :  { %1078 = dma.done.wait [#allocation15], 512  }
 0x3bf   :  { %1079 = vsyncadd [#allocation15], 4294966784 }
 0x3c0   :  { %684 = vsyncpa [#allocation3], 1 }
 0x3c1   :  { %685 = vsyncpa [#allocation6], 1 }
 0x3c2   :  { %686 = vsyncpa [#allocation9], 1 }
 0x3c3   :  { %687 = vsyncpa [#allocation12], 1 }
 0x3c4   :  { %688 = vsyncpa [#allocation4], 1 }
 0x3c5   :  { %689 = vsyncpa [#allocation15], 1 }

// kernel: tpu_custom_call.1
= control target key start
LH: loop header
LB: loop body
LE: loop exit
PB: predicated region body
PF: predicated region fallthrough
CT: control target
= control target key end

     0   :  { %17 = vsyncpa [#allocation3], 0  ;;  %s1241_s0 = inlined_call_operand.hbm [shape: bf16[16,128], index: 0, kind: input, shape index: {}]   ;;  %s1242_s1 = inlined_call_operand.hbm [shape: bf16[16,128], index: 1, kind: input, shape index: {}]   ;;  %s1243_s2 = inlined_call_operand.hbm [shape: bf16[128,128], index: 2, kind: input, shape index: {}]   ;;  %s1244_s3 = inlined_call_operand.vmem [shape: f32[1,128], index: 3, kind: input, shape index: {}]   ;;  %s1245_s4 = inlined_call_operand.hbm [shape: bf16[128,256], index: 4, kind: input, shape index: {}]   ;;  %s1246_s5 = inlined_call_operand.vmem [shape: f32[1,256], index: 5, kind: input, shape index: {}]   ;;  %s1247_s6 = inlined_call_operand.hbm [shape: bf16[128,128], index: 6, kind: input, shape index: {}]   ;;  %s1248_s7 = inlined_call_operand.vmem [shape: f32[1,128], index: 7, kind: input, shape index: {}]   ;;  %s1249_s8 = inlined_call_operand.hbm [shape: bf16[128,128], index: 8, kind: input, shape index: {}]   ;;  %s1250_s9 = inlined_call_operand.vmem [shape: f32[1,128], index: 9, kind: input, shape index: {}]   ;;  %s1251_s10 = inlined_call_operand.hbm [shape: bf16[16,128], index: 10, kind: output, shape index: {0}]   ;;  %s1252_s11 = inlined_call_operand.hbm [shape: f32[16,256], index: 11, kind: output, shape index: {1}]  }
   0x1   :  { %18 = vsyncpa [#allocation6], 0 }
   0x2   :  { %19 = vsyncpa [#allocation9], 0 }
   0x3   :  { %20 = vsyncpa [#allocation12], 0 }
   0x4   :  { %21 = vsyncpa [#allocation4], 0 }
   0x5   :  { %22 = vsyncpa [#allocation15], 0  ;;  %s1080_s17 = smov [#allocation5]   ;;  %s1081_s19 = smov [#allocation8]  }
   0x6   :  { %s40_s18 = sshll.u32 %s1080_s17, 4  ;;  %s66_s20 = sshll.u32 %s1081_s19, 4  ;;  %s41_s18 = int_to_ptr.vmem [resolvable:$true] %s40_s18  ;;  %s67_s20 = int_to_ptr.vmem [resolvable:$true] %s66_s20 }
   0x7   :  { %s916_s21 = scalar_lea.vmem %s41_s18, 128  ;;  %p921_p1 = scmp.lt.s32.totalorder %s41_s18, %s41_s18 }
   0x8   :  { %p917_p0 = scmp.ne.s32.totalorder %s41_s18, %s916_s21  ;;  %p922_p2 = scmp.lt.s32.totalorder %s916_s21, %s916_s21 }
   0xa   :  { %p923_p3 = por %p922_p2, %p921_p1 }
   0xc   :  { %p924_p4 = pnand %p923_p3, %p917_p0 }
   0xe   :  { %927 = shalt.err (!%p924_p4)
}
   0xf   :  { %s1082_s22 = smov 64   ;;  %s1083_s23 = smov 4  }
  0x10   :  { %46 = dma.hbm_to_vmem [thread:$0]  %s1242_s1, 128, %s41_s18, [#allocation6], %s1082_s22, %s1082_s22, %s1083_s23  }
  0x11   :  { %s936_s26 = scalar_lea.vmem %s67_s20, 2048  ;;  %p941_p6 = scmp.lt.s32.totalorder %s67_s20, %s67_s20 }
  0x12   :  { %p937_p5 = scmp.ne.s32.totalorder %s67_s20, %s936_s26  ;;  %p942_p7 = scmp.lt.s32.totalorder %s936_s26, %s936_s26 }
  0x14   :  { %p943_p8 = por %p942_p7, %p941_p6 }
  0x16   :  { %p944_p9 = pnand %p943_p8, %p937_p5 }
  0x18   :  { %947 = shalt.err (!%p944_p9)
}
  0x19   :  { %s1084_s27 = smov 128   ;;  %s1085_s28 = smov 8  }
  0x1a   :  { %72 = dma.hbm_to_vmem [thread:$0]  %s1245_s4, 2048, %s67_s20, [#allocation9], %s1084_s27, %s1084_s27, %s1085_s28  }
  0x1b   :  { %s1086_s12 = smov [#allocation2]   ;;  %s1087_s14 = smov [#allocation7]  }
  0x1c   :  { %s28_s13 = sshll.u32 %s1086_s12, 4  ;;  %s52_s15 = sshll.u32 %s1087_s14, 4  ;;  %s29_s13 = int_to_ptr.vmem [resolvable:$true] %s28_s13  ;;  %s53_s15 = int_to_ptr.vmem [resolvable:$true] %s52_s15 }
  0x1d   :  { %s956_s1 = scalar_lea.vmem %s29_s13, 128  ;;  %p961_p11 = scmp.lt.s32.totalorder %s29_s13, %s29_s13 }
  0x1e   :  { %p957_p10 = scmp.ne.s32.totalorder %s29_s13, %s956_s1  ;;  %p962_p12 = scmp.lt.s32.totalorder %s956_s1, %s956_s1 }
  0x20   :  { %p963_p13 = por %p962_p12, %p961_p11 }
  0x22   :  { %p964_p0 = pnand %p963_p13, %p957_p10 }
  0x24   :  { %967 = shalt.err (!%p964_p0)
}
  0x25   :  { %34 = dma.hbm_to_vmem [thread:$0]  %s1241_s0, 128, %s29_s13, [#allocation3], %s1082_s22, %s1082_s22, %s1083_s23  }
  0x26   :  { %s976_s4 = scalar_lea.vmem %s53_s15, 1024  ;;  %p981_p2 = scmp.lt.s32.totalorder %s53_s15, %s53_s15 }
  0x27   :  { %p977_p1 = scmp.ne.s32.totalorder %s53_s15, %s976_s4  ;;  %p982_p3 = scmp.lt.s32.totalorder %s976_s4, %s976_s4 }
  0x29   :  { %p983_p4 = por %p982_p3, %p981_p2 }
  0x2b   :  { %p984_p5 = pnand %p983_p4, %p977_p1 }
  0x2d   :  { %987 = shalt.err (!%p984_p5)
}
  0x2e   :  { %58 = dma.hbm_to_vmem [thread:$0]  %s1243_s2, 1024, %s53_s15, [#allocation6], %s1082_s22, %s1082_s22, %s1083_s23  }
  0x2f   :  { %s1088_s20 = smov [#allocation10]   ;;  %s1089_s24 = smov [#allocation11]  }
  0x30   :  { %s80_s21 = sshll.u32 %s1088_s20, 4  ;;  %s94_s25 = sshll.u32 %s1089_s24, 4  ;;  %s81_s21 = int_to_ptr.vmem [resolvable:$true] %s80_s21  ;;  %s95_s25 = int_to_ptr.vmem [resolvable:$true] %s94_s25 }
  0x31   :  { %s996_s0 = scalar_lea.vmem %s81_s21, 1024  ;;  %p1001_p7 = scmp.lt.s32.totalorder %s81_s21, %s81_s21 }
  0x32   :  { %p997_p6 = scmp.ne.s32.totalorder %s81_s21, %s996_s0  ;;  %p1002_p8 = scmp.lt.s32.totalorder %s996_s0, %s996_s0 }
  0x34   :  { %p1003_p9 = por %p1002_p8, %p1001_p7 }
  0x36   :  { %p1004_p10 = pnand %p1003_p9, %p997_p6 }
  0x38   :  { %1007 = shalt.err (!%p1004_p10)
}
  0x39   :  { %86 = dma.hbm_to_vmem [thread:$0]  %s1247_s6, 1024, %s81_s21, [#allocation9], %s1082_s22, %s1082_s22, %s1083_s23  }
  0x3a   :  { %s1016_s2 = scalar_lea.vmem %s95_s25, 1024  ;;  %p1021_p12 = scmp.lt.s32.totalorder %s95_s25, %s95_s25 }
  0x3b   :  { %p1017_p11 = scmp.ne.s32.totalorder %s95_s25, %s1016_s2  ;;  %p1022_p13 = scmp.lt.s32.totalorder %s1016_s2, %s1016_s2 }
  0x3d   :  { %p1023_p0 = por %p1022_p13, %p1021_p12 }
  0x3f   :  { %p1024_p1 = pnand %p1023_p0, %p1017_p11 }
  0x41   :  { %1027 = shalt.err (!%p1024_p1)
}
  0x42   :  { %100 = dma.hbm_to_vmem [thread:$0]  %s1249_s8, 1024, %s95_s25, [#allocation12], %s1082_s22, %s1082_s22, %s1083_s23  }
  0x43   :  { %1068 = dma.done.wait [#allocation3], 128  }
  0x44   :  { %1069 = vsyncadd [#allocation3], 4294967168 }
  0x45   :  { %1070 = dma.done.wait [#allocation6], 1152  }
  0x46   :  { %1071 = vsyncadd [#allocation6], 4294966144 }
  0x47   :  { %1072 = dma.done.wait [#allocation9], 3072  }
  0x48   :  { %1073 = vsyncadd [#allocation9], 4294964224 }
  0x49   :  { %1074 = dma.done.wait [#allocation12], 1024  }
  0x4a   :  { %1075 = vsyncadd [#allocation12], 4294966272  ;;  %v1090_v0 = vmov 0.0   ;;  %vm1091_vm0 = vmmov 0   ;;  %v851_v1 = vld [vmem:[#allocation7 + $0x38] sm:$0xff]   ;;  %v852_v2 = vld [vmem:[#allocation7 + $0x30] sm:$0xff]   ;;  %v267_v50 = vlaneseq }
  0x4b   :  { %774 = vmatprep.subr.bf16.mxu0 %v1090_v0  ;;  %790 = vmatprep.mubr.msk.bf16.mxu0 %vm1091_vm0, %v1090_v0  ;;  %v853_v3 = vld [vmem:[#allocation7 + $0x28] sm:$0xff]   ;;  %v854_v4 = vld [vmem:[#allocation7 + $0x20] sm:$0xff]   ;;  %v860_v5 = vld [vmem:[#allocation8 + $0x74] ss:$8 sps:$4 sm:$0xff]   ;;  %v1092_v26 = vmov 0   ;;  %s1093_s13 = smov [#allocation14]  }
  0x4c   :  { %775 = vmatpush3.bf16.msra.mxu0 %v851_v1  ;;  %v862_v6 = vld [vmem:[#allocation8 + $0x70] ss:$8 sps:$4 sm:$0xff]   ;;  %357 = vmatprep.subr.bf16.mxu1 %v860_v5  ;;  %v863_v7 = vld [vmem:[#allocation8 + $0x64] ss:$8 sps:$4 sm:$0xff]   ;;  %v865_v8 = vld [vmem:[#allocation8 + $0x60] ss:$8 sps:$4 sm:$0xff]  }
  0x4d   :  { %776 = vmatprep.subr.bf16.mxu0 %v1090_v0  ;;  %358 = vmatpush1.bf16.msra.mxu1 %v862_v6  ;;  %v866_v9 = vld [vmem:[#allocation8 + $0x54] ss:$8 sps:$4 sm:$0xff]   ;;  %v868_v12 = vld [vmem:[#allocation8 + $0x50] ss:$8 sps:$4 sm:$0xff]   ;;  %v869_v13 = vld [vmem:[#allocation8 + $0x44] ss:$8 sps:$4 sm:$0xff]  }
  0x4e   :  { %359 = vmatprep.subr.bf16.mxu1 %v863_v7  ;;  %v855_v10 = vld [vmem:[#allocation7 + $0x18] sm:$0xff]   ;;  %v856_v11 = vld [vmem:[#allocation7 + $0x10] sm:$0xff]   ;;  %v871_v14 = vld [vmem:[#allocation8 + $0x40] ss:$8 sps:$4 sm:$0xff]   ;;  %389 = vmatprep.mubr.bf16.mxu1 %v1092_v26  ;;  %v268_v51 = vshrl.u32 %v267_v50, 7  ;;  %s671_s14 = sshll.u32 %s1093_s13, 4  ;;  %s672_s14 = int_to_ptr.vmem [resolvable:$true] %s671_s14 }
  0x4f   :  { %v872_v15 = vld [vmem:[#allocation8 + $0x34] ss:$8 sps:$4 sm:$0xff]   ;;  %v857_v16 = vld [vmem:[#allocation7 + $0x8] sm:$0xff]   ;;  %v874_v17 = vld [vmem:[#allocation8 + $0x30] ss:$8 sps:$4 sm:$0xff]   ;;  %s1028_s15 = scalar_lea.vmem %s672_s14, 512  ;;  %p1033_p3 = scmp.lt.s32.totalorder %s672_s14, %s672_s14 }
  0x50   :  { %777 = vmatpush3.bf16.msra.mxu0 %v852_v2  ;;  %v875_v18 = vld [vmem:[#allocation8 + $0x24] ss:$8 sps:$4 sm:$0xff]   ;;  %v859_v20 = vld [vmem:[#allocation2] sm:$0xff]   ;;  %v877_v21 = vld [vmem:[#allocation8 + $0x20] ss:$8 sps:$4 sm:$0xff]   ;;  %v269_v52 = vsub.s32 0, %v268_v51  ;;  %p1029_p2 = scmp.ne.s32.totalorder %s672_s14, %s1028_s15  ;;  %p1034_p4 = scmp.lt.s32.totalorder %s1028_s15, %s1028_s15 }
  0x51   :  { %778 = vmatprep.subr.bf16.mxu0 %v1090_v0  ;;  %360 = vmatpush1.bf16.msra.mxu1 %v865_v8  ;;  %v858_v19 = vld [vmem:[#allocation7] sm:$0xff]   ;;  %v878_v22 = vld [vmem:[#allocation8 + $0x14] ss:$8 sps:$4 sm:$0xff]   ;;  %v880_v23 = vld [vmem:[#allocation8 + $0x10] ss:$8 sps:$4 sm:$0xff]   ;;  %v273_v54 = vsub.s32 1, %v268_v51 }
  0x52   :  { %361 = vmatprep.subr.bf16.mxu1 %v866_v9  ;;  %v881_v24 = vld [vmem:[#allocation8 + $0x4] ss:$8 sps:$4 sm:$0xff]   ;;  %v883_v25 = vld [vmem:[#allocation8] ss:$8 sps:$4 sm:$0xff]   ;;  %v690_v27 = vld [vmem:[%s1244_s3] ss:$0 sm:$0xff]  ;;  %p1035_p5 = por %p1034_p4, %p1033_p3 }
  0x53   :  { %v884_v37 = vld [vmem:[#allocation10 + $0x38] sm:$0xff]   ;;  %v885_v38 = vld [vmem:[#allocation10 + $0x30] sm:$0xff]   ;;  %v886_v39 = vld [vmem:[#allocation10 + $0x28] sm:$0xff]  }
  0x54   :  { %779 = vmatpush3.bf16.msra.mxu0 %v853_v3  ;;  %v887_v40 = vld [vmem:[#allocation10 + $0x20] sm:$0xff]   ;;  %v888_v41 = vld [vmem:[#allocation10 + $0x18] sm:$0xff]   ;;  %v889_v42 = vld [vmem:[#allocation10 + $0x10] sm:$0xff]   ;;  %p1036_p6 = pnand %p1035_p5, %p1029_p2 }
  0x55   :  { %780 = vmatprep.subr.bf16.mxu0 %v1090_v0  ;;  %362 = vmatpush1.bf16.msra.mxu1 %v868_v12  ;;  %v890_v43 = vld [vmem:[#allocation10 + $0x8] sm:$0xff]   ;;  %v891_v44 = vld [vmem:[#allocation10] sm:$0xff]   ;;  %v892_v45 = vld [vmem:[#allocation11 + $0x38] sm:$0xff]  }
  0x56   :  { %363 = vmatprep.subr.bf16.mxu1 %v869_v13  ;;  %v893_v46 = vld [vmem:[#allocation11 + $0x30] sm:$0xff]   ;;  %v894_v47 = vld [vmem:[#allocation11 + $0x28] sm:$0xff]   ;;  %v895_v48 = vld [vmem:[#allocation11 + $0x20] sm:$0xff]  }
  0x57   :  { %v896_v49 = vld [vmem:[#allocation11 + $0x18] sm:$0xff]   ;;  %v265_v53 = vld [vmem:[%s1246_s5] sm:$0x3] }
  0x58   :  { %781 = vmatpush3.bf16.msra.mxu0 %v854_v4  ;;  %v270_v55 = vrot.slane %v265_v53, %v269_v52  ;;  %v274_v56 = vrot.slane %v265_v53, %v273_v54  ;;  %v739_v6 = vld [vmem:[#allocation5] sm:$0xff]  }
  0x59   :  { %782 = vmatprep.subr.bf16.mxu0 %v1090_v0  ;;  %364 = vmatpush1.bf16.msra.mxu1 %v871_v14  ;;  %v740_v7 = vunpack.c.l.bf16 %v739_v6  ;;  %v741_v9 = vunpack.c.h.bf16 %v739_v6 }
  0x5a   :  { %365 = vmatprep.subr.bf16.mxu1 %v872_v15 }
  0x5c   :  { %783 = vmatpush3.bf16.msra.mxu0 %v855_v10 }
  0x5d   :  { %784 = vmatprep.subr.bf16.mxu0 %v1090_v0  ;;  %366 = vmatpush1.bf16.msra.mxu1 %v874_v17  ;;  %v898_v17 = vld [vmem:[#allocation11 + $0x8] sm:$0xff]  }
  0x5e   :  { %367 = vmatprep.subr.bf16.mxu1 %v875_v18  ;;  %v899_v18 = vld [vmem:[#allocation11] sm:$0xff]  }
  0x60   :  { %785 = vmatpush3.bf16.msra.mxu0 %v856_v11 }
  0x61   :  { %786 = vmatprep.subr.bf16.mxu0 %v1090_v0  ;;  %368 = vmatpush1.bf16.msra.mxu1 %v877_v21 }
  0x62   :  { %369 = vmatprep.subr.bf16.mxu1 %v878_v22 }
  0x64   :  { %787 = vmatpush3.bf16.msra.mxu0 %v857_v16  ;;  %v897_v16 = vld [vmem:[#allocation11 + $0x10] sm:$0xff]  }
  0x65   :  { %788 = vmatprep.subr.bf16.mxu0 %v1090_v0  ;;  %370 = vmatpush1.bf16.msra.mxu1 %v880_v23 }
  0x66   :  { %371 = vmatprep.subr.bf16.mxu1 %v881_v24 }
  0x68   :  { %789 = vmatpush3.bf16.msra.mxu0 %v858_v19  ;;  %v716_v19 = vld [vmem:[%s1248_s7] ss:$0 sm:$0xff] }
  0x69   :  { %794 = vmatprep.subr.bf16.mxu0 %v1090_v0  ;;  %372 = vmatpush1.bf16.msra.mxu1 %v883_v25 }
  0x6a   :  { %814 = vmatprep.subr.bf16.mxu1 %v1090_v0 }
  0x6b   :  { %791 = vmatmul.mubr.bf16.vlgmr.msra.gmra.mxu0 %v859_v20 }
  0x6c   :  { %810 = vmatprep.mubr.msk.bf16.mxu0 %vm1091_vm0, %v1090_v0  ;;  %795 = vmatpush3.bf16.msra.mxu0 %v884_v37 }
  0x6d   :  { %796 = vmatprep.subr.bf16.mxu0 %v1090_v0 }
  0x70   :  { %797 = vmatpush3.bf16.msra.mxu0 %v885_v38 }
  0x71   :  { %798 = vmatprep.subr.bf16.mxu0 %v1090_v0 }
  0x74   :  { %799 = vmatpush3.bf16.msra.mxu0 %v886_v39 }
  0x75   :  { %800 = vmatprep.subr.bf16.mxu0 %v1090_v0 }
  0x78   :  { %801 = vmatpush3.bf16.msra.mxu0 %v887_v40 }
  0x79   :  { %802 = vmatprep.subr.bf16.mxu0 %v1090_v0 }
  0x7c   :  { %803 = vmatpush3.bf16.msra.mxu0 %v888_v41 }
  0x7d   :  { %804 = vmatprep.subr.bf16.mxu0 %v1090_v0 }
  0x80   :  { %805 = vmatpush3.bf16.msra.mxu0 %v889_v42 }
  0x81   :  { %806 = vmatprep.subr.bf16.mxu0 %v1090_v0 }
  0x84   :  { %807 = vmatpush3.bf16.msra.mxu0 %v890_v43 }
  0x85   :  { %808 = vmatprep.subr.bf16.mxu0 %v1090_v0 }
  0x88   :  { %809 = vmatpush3.bf16.msra.mxu0 %v891_v44 }
 0x12b   :  { %v239_v28 = vpop.f32.mrf.mxu0 }
 0x12c   :  { %v240_v30 = vadd.f32 %v690_v27, %v239_v28 }
 0x12d   :  { %v792_v29 = vpop.f32.mrf.mxu0 }
 0x12e   :  { %v246_v34 = vmax.f32 %v240_v30, 0.0 }
 0x12f   :  { %v242_v31 = vpop.f32.mrf.mxu0 }
 0x130   :  { %v243_v32 = vadd.f32 %v690_v27, %v242_v31 }
 0x131   :  { %v793_v33 = vpop.f32.mrf.mxu0 }
 0x132   :  { %v247_v35 = vmax.f32 %v243_v32, 0.0 }
 0x134   :  { %v248_v36 = vpack.c.bf16 %v247_v35, %v246_v34 }
 0x136   :  { %390 = vmatmul.mubr.bf16.vlgmr.msra.gmra.mxu1 %v248_v36 }
 0x137   :  { %830 = vmatprep.mubr.msk.bf16.mxu1 %vm1091_vm0, %v1090_v0  ;;  %815 = vmatpush3.bf16.msra.mxu1 %v892_v45 }
 0x138   :  { %816 = vmatprep.subr.bf16.mxu1 %v1090_v0 }
 0x13b   :  { %817 = vmatpush3.bf16.msra.mxu1 %v893_v46 }
 0x13c   :  { %818 = vmatprep.subr.bf16.mxu1 %v1090_v0 }
 0x13f   :  { %819 = vmatpush3.bf16.msra.mxu1 %v894_v47 }
 0x140   :  { %820 = vmatprep.subr.bf16.mxu1 %v1090_v0 }
 0x143   :  { %821 = vmatpush3.bf16.msra.mxu1 %v895_v48 }
 0x144   :  { %822 = vmatprep.subr.bf16.mxu1 %v1090_v0 }
 0x147   :  { %823 = vmatpush3.bf16.msra.mxu1 %v896_v49 }
 0x148   :  { %824 = vmatprep.subr.bf16.mxu1 %v1090_v0 }
 0x14b   :  { %825 = vmatpush3.bf16.msra.mxu1 %v897_v16 }
 0x14c   :  { %826 = vmatprep.subr.bf16.mxu1 %v1090_v0 }
 0x14f   :  { %827 = vmatpush3.bf16.msra.mxu1 %v898_v17 }
 0x150   :  { %828 = vmatprep.subr.bf16.mxu1 %v1090_v0 }
 0x153   :  { %829 = vmatpush3.bf16.msra.mxu1 %v899_v18 }
 0x1f6   :  { %v391_v57 = vpop.f32.mrf.mxu1 }
 0x1f7   :  { %v392_v58 = vadd.f32 %v391_v57, %v270_v55 }
 0x1f8   :  { %v393_v59 = vpop.f32.mrf.mxu1 }
 0x1f9   :  { %400 = vst [vmem:[#allocation14] sm:$0xff] %v392_v58  ;;  %v394_v60 = vadd.f32 %v393_v59, %v274_v56 }
 0x1fa   :  { %v395_v61 = vpop.f32.mrf.mxu1 }
 0x1fb   :  { %401 = vst [vmem:[#allocation14 + $0x8] sm:$0xff] %v394_v60  ;;  %v404_v62 = vmul.f32 0.5, %v394_v60  ;;  %v396_v63 = vadd.f32 %v395_v61, %v270_v55 }
 0x1fc   :  { %v397_v1 = vpop.f32.mrf.mxu1 }
 0x1fd   :  { %v406_v2 = vmul.f32 1.442695, %v404_v62  ;;  %402 = vst [vmem:[#allocation14 + $0x10] sm:$0xff] %v396_v63  ;;  %v398_v3 = vadd.f32 %v397_v1, %v274_v56 }
 0x1ff   :  { %900 = vpow2.f32 %v406_v2  ;;  %403 = vst [vmem:[#allocation14 + $0x18] sm:$0xff] %v398_v3  ;;  %v405_v4 = vmul.f32 0.5, %v398_v3 }
 0x201   :  { %v408_v5 = vmul.f32 1.442695, %v405_v4 }
 0x203   :  { %902 = vpow2.f32 %v408_v5 }
 0x20c   :  { %v901_v8 = vpop.eup %900 }
 0x20d   :  { %v410_v10 = vmul.f32 %v901_v8, %v740_v7 }
 0x20f   :  { %v412_v13 = vadd.f32 %v410_v10, %v392_v58 }
 0x210   :  { %v903_v11 = vpop.eup %902 }
 0x211   :  { %v411_v12 = vmul.f32 %v903_v11, %v741_v9 }
 0x213   :  { %v413_v14 = vadd.f32 %v411_v12, %v396_v63 }
 0x215   :  { %v414_v15 = vpack.c.bf16 %v413_v14, %v412_v13 }
 0x217   :  { %811 = vmatmul.mubr.bf16.vlgmr.msra.gmra.mxu0 %v414_v15 }
 0x2d7   :  { %v520_v20 = vpop.f32.mrf.mxu0 }
 0x2d8   :  { %v521_v22 = vadd.f32 %v716_v19, %v520_v20 }
 0x2d9   :  { %v812_v21 = vpop.f32.mrf.mxu0 }
 0x2da   :  { %v527_v26 = vmax.f32 %v521_v22, 0.0 }
 0x2db   :  { %v523_v23 = vpop.f32.mrf.mxu0 }
 0x2dc   :  { %v524_v24 = vadd.f32 %v716_v19, %v523_v23 }
 0x2dd   :  { %v813_v25 = vpop.f32.mrf.mxu0 }
 0x2de   :  { %v528_v27 = vmax.f32 %v524_v24, 0.0 }
 0x2e0   :  { %v529_v28 = vpack.c.bf16 %v528_v27, %v527_v26 }
 0x2e2   :  { %831 = vmatmul.mubr.bf16.vlgmr.msra.gmra.mxu1 %v529_v28 }
 0x2e3   :  { %1039 = shalt.err (!%p1036_p6)
}
 0x2e4   :  { %s1094_s7 = smov 256   ;;  %s1095_s1 = smov 16   ;;  %v725_v0 = vld [vmem:[%s1250_s9] ss:$0 sm:$0xff] }
 0x2e5   :  { %677 = dma.vmem_to_hbm [thread:$0]  %s672_s14, 512, %s1252_s11, [#allocation15], %s1094_s7, %s1094_s7, %s1095_s1  }
 0x2e6   :  { %s1096_s19 = smov [#allocation13]  }
 0x2e7   :  { %s659_s20 = sshll.u32 %s1096_s19, 4  ;;  %s660_s20 = int_to_ptr.vmem [resolvable:$true] %s659_s20 }
 0x2e8   :  { %s1048_s11 = scalar_lea.vmem %s660_s20, 128  ;;  %p1053_p8 = scmp.lt.s32.totalorder %s660_s20, %s660_s20 }
 0x2e9   :  { %p1049_p7 = scmp.ne.s32.totalorder %s660_s20, %s1048_s11  ;;  %p1054_p9 = scmp.lt.s32.totalorder %s1048_s11, %s1048_s11 }
 0x2eb   :  { %p1055_p10 = por %p1054_p9, %p1053_p8 }
 0x2ed   :  { %p1056_p11 = pnand %p1055_p10, %p1049_p7 }
 0x3a2   :  { %v635_v29 = vpop.f32.mrf.mxu1 }
 0x3a3   :  { %v636_v30 = vadd.f32 %v725_v0, %v635_v29 }
 0x3a4   :  { %v832_v31 = vpop.f32.mrf.mxu1 }
 0x3a5   :  { %904 = vtanh.f32 %v636_v30 }
 0x3a6   :  { %v638_v32 = vpop.f32.mrf.mxu1 }
 0x3a7   :  { %v639_v33 = vadd.f32 %v725_v0, %v638_v32 }
 0x3a8   :  { %v833_v34 = vpop.f32.mrf.mxu1 }
 0x3a9   :  { %906 = vtanh.f32 %v639_v33 }
 0x3b2   :  { %v905_v35 = vpop.eup %904 }
 0x3b6   :  { %v907_v36 = vpop.eup %906 }
 0x3b7   :  { %v745_v37 = vpack.c.bf16 %v907_v36, %v905_v35 }
 0x3b9   :  { %746 = vst [vmem:[#allocation13] sm:$0xff] %v745_v37  }
 0x3ba   :  { %1059 = shalt.err (!%p1056_p11)
}
 0x3bb   :  { %665 = dma.vmem_to_hbm [thread:$0]  %s660_s20, 128, %s1251_s10, [#allocation4], %s1082_s22, %s1082_s22, %s1083_s23  }
 0x3bc   :  { %1076 = dma.done.wait [#allocation4], 128  }
 0x3bd   :  { %1077 = vsyncadd [#allocation4], 4294967168 }
 0x3be   :  { %1078 = dma.done.wait [#allocation15], 512  }
 0x3bf   :  { %1079 = vsyncadd [#allocation15], 4294966784 }
 0x3c0   :  { %684 = vsyncpa [#allocation3], 1 }
 0x3c1   :  { %685 = vsyncpa [#allocation6], 1 }
 0x3c2   :  { %686 = vsyncpa [#allocation9], 1 }
 0x3c3   :  { %687 = vsyncpa [#allocation12], 1 }
 0x3c4   :  { %688 = vsyncpa [#allocation4], 1 }
 0x3c5   :  { %689 = vsyncpa [#allocation15], 1 }

</bundles_post_ra>
